<compile_context>
chip_gen: v7x
topology: tpu7x:2x2x1
jax: 0.10.0
libtpu: 0.0.40
codegen_flags: <defaults>
</compile_context>

<pallas_src>
import jax
import jax.numpy as jnp
from jax.experimental import pallas as pl
from jax.experimental.pallas import tpu as pltpu  # noqa: F401  (TPU backend)


def _mlp_kernel(x_ref, p_ref, o_ref):
    """Fused MLP in feature-major (batch-on-lanes) layout.

    x_ref: (1, B)       input, batch on lanes
    p_ref: (H, H + 5)   packed params:
        [:, 0:H]   -> W2          (H, H), (out, in) orientation
        [:, H+0]   -> W1[:, 0]    column (H,)
        [:, H+1]   -> b1          column (H,)
        [:, H+2]   -> b2          column (H,)
        [:, H+3]   -> W3[0, :]    column (H,)  (= W3^T)
        [0, H+4]   -> b3          scalar
    o_ref: (1, B)
    """
    H = p_ref.shape[0]
    x = x_ref[...]                                    # (1, B)

    w2 = p_ref[:, 0:H]                                # (H, H)
    w1 = p_ref[:, H + 0:H + 1]                        # (H, 1)
    b1 = p_ref[:, H + 1:H + 2]                        # (H, 1)
    b2 = p_ref[:, H + 2:H + 3]                        # (H, 1)
    w3 = p_ref[:, H + 3:H + 4]                        # (H, 1)
    b3 = p_ref[0:1, H + 4:H + 5]                      # (1, 1)

    # Layer 1 (K=1): pure VPU outer product, no MXU pass, bias fused in.
    h1 = jnp.maximum(w1 * x + b1, 0.0)                # (H, B)
    # Layer 2: the one real matmul; W2 already oriented, no in-kernel .T.
    h2 = jnp.dot(w2, h1, preferred_element_type=jnp.float32) + b2
    h2 = jnp.maximum(h2, 0.0)                         # (H, B)
    # Layer 3 (N=1): multiply + sublane reduce -> lane-dense (1, B) output.
    out = jnp.sum(w3 * h2, axis=0, keepdims=True) + b3
    o_ref[...] = out.astype(o_ref.dtype)


def pack_params(params):
    """Pack PyTorch-layout params (W1,b1,W2,b2,W3,b3) into one (H, H+5) slab."""
    w1, b1, w2, b2, w3, b3 = params
    H = w2.shape[0]
    b3_col = jnp.zeros((H, 1), jnp.float32).at[0, 0].set(
        jnp.asarray(b3, jnp.float32).reshape(()))
    cols = [
        jnp.asarray(w2, jnp.float32),                  # (H, H)
        jnp.asarray(w1, jnp.float32).reshape(H, 1),    # W1 column
        jnp.asarray(b1, jnp.float32).reshape(H, 1),
        jnp.asarray(b2, jnp.float32).reshape(H, 1),
        jnp.asarray(w3, jnp.float32).reshape(H, 1),    # W3^T column
        b3_col,
    ]
    return jnp.concatenate(cols, axis=1)               # (H, H+5)


def mlp_forward(x, packed):
    """x: (B, 1) f32 (PyTorch layout). packed: output of pack_params."""
    B = x.shape[0]
    x_lanes = x.reshape(1, B)                          # batch-on-lanes (free)
    full = lambda shape: pl.BlockSpec(shape, lambda: (0,) * len(shape))
    out = pl.pallas_call(
        _mlp_kernel,
        out_shape=jax.ShapeDtypeStruct((1, B), jnp.float32),
        in_specs=[full((1, B)), full(packed.shape)],
        out_specs=full((1, B)),
    )(x_lanes, packed)
    return out.reshape(B, 1)                           # back to PyTorch layout


def net_forward(x, params):
    """Convenience: PyTorch-layout params -> pack -> fused kernel."""
    return mlp_forward(x, pack_params(params))


def _init_params(key):
    """Deterministic init mimicking nn.Linear's U(-1/sqrt(fan_in), 1/sqrt(fan_in))."""
    ks = jax.random.split(key, 6)

    def lin(kw, kb, out_f, in_f):
        bound = 1.0 / (in_f ** 0.5)
        w = jax.random.uniform(kw, (out_f, in_f), jnp.float32, -bound, bound)
        b = jax.random.uniform(kb, (out_f,), jnp.float32, -bound, bound)
        return w, b

    w1, b1 = lin(ks[0], ks[1], 40, 1)
    w2, b2 = lin(ks[2], ks[3], 40, 40)
    w3, b3 = lin(ks[4], ks[5], 1, 40)
    return (w1, b1, w2, b2, w3, b3)


def _reference(x, params):
    w1, b1, w2, b2, w3, b3 = params
    h = jnp.maximum(x @ w1.T + b1, 0.0)
    h = jnp.maximum(h @ w2.T + b2, 0.0)
    return h @ w3.T + b3


if __name__ == "__main__":
    key = jax.random.PRNGKey(0)
    kx, kp = jax.random.split(key)
    B = 8
    x = jax.random.normal(kx, (B, 1), jnp.float32)
    params = _init_params(kp)

    packed = pack_params(params)
    out = jax.block_until_ready(mlp_forward(x, packed))

    ref = _reference(x, params)
    assert out.shape == (B, 1)
    assert jnp.allclose(out, ref, atol=1e-4, rtol=1e-4), (out, ref)
    print("KERNEL_OK")
</pallas_src>

<mosaic_0001>
module attributes {stable_mosaic.version = 11 : i64} {
  func.func @_mlp_kernel(%arg0: memref<1x8xf32, #tpu.memory_space<vmem>>, %arg1: memref<40x45xf32, #tpu.memory_space<vmem>>, %arg2: memref<1x8xf32, #tpu.memory_space<vmem>>) attributes {dimension_semantics = [], scalar_prefetch = 0 : i64, scratch_operands = 0 : i64, tpu.core_type = #tpu.core_type<tc>} {
    %c0 = arith.constant 0 : index
    %c0_0 = arith.constant 0 : index
    %0 = vector.load %arg0[%c0, %c0_0] : memref<1x8xf32, #tpu.memory_space<vmem>>, vector<1x8xf32>
    %c0_1 = arith.constant 0 : index
    %c0_2 = arith.constant 0 : index
    %1 = vector.load %arg1[%c0_1, %c0_2] : memref<40x45xf32, #tpu.memory_space<vmem>>, vector<40x40xf32>
    %c0_3 = arith.constant 0 : index
    %c40 = arith.constant 40 : index
    %2 = vector.load %arg1[%c0_3, %c40] : memref<40x45xf32, #tpu.memory_space<vmem>>, vector<40x1xf32>
    %c0_4 = arith.constant 0 : index
    %c41 = arith.constant 41 : index
    %3 = vector.load %arg1[%c0_4, %c41] : memref<40x45xf32, #tpu.memory_space<vmem>>, vector<40x1xf32>
    %c0_5 = arith.constant 0 : index
    %c42 = arith.constant 42 : index
    %4 = vector.load %arg1[%c0_5, %c42] : memref<40x45xf32, #tpu.memory_space<vmem>>, vector<40x1xf32>
    %c0_6 = arith.constant 0 : index
    %c43 = arith.constant 43 : index
    %5 = vector.load %arg1[%c0_6, %c43] : memref<40x45xf32, #tpu.memory_space<vmem>>, vector<40x1xf32>
    %c0_7 = arith.constant 0 : index
    %c44 = arith.constant 44 : index
    %6 = vector.load %arg1[%c0_7, %c44] : memref<40x45xf32, #tpu.memory_space<vmem>>, vector<1x1xf32>
    %7 = vector.broadcast %2 : vector<40x1xf32> to vector<40x8xf32>
    %8 = vector.broadcast %0 : vector<1x8xf32> to vector<40x8xf32>
    %9 = arith.mulf %7, %8 : vector<40x8xf32>
    %10 = vector.broadcast %3 : vector<40x1xf32> to vector<40x8xf32>
    %11 = arith.addf %9, %10 : vector<40x8xf32>
    %cst = arith.constant 0.000000e+00 : f32
    %12 = vector.broadcast %cst : f32 to vector<40x8xf32>
    %13 = arith.maximumf %11, %12 : vector<40x8xf32>
    %cst_8 = arith.constant dense<0.000000e+00> : vector<40x8xf32>
    %14 = tpu.matmul %1, %13, %cst_8 {dimension_numbers = #tpu.dot_dimension_numbers<[1], [0], [0], [1], [0, 0, 1, 1], [], []>} : vector<40x40xf32>, vector<40x8xf32>, vector<40x8xf32> -> vector<40x8xf32>
    %15 = vector.broadcast %4 : vector<40x1xf32> to vector<40x8xf32>
    %16 = arith.addf %14, %15 : vector<40x8xf32>
    %cst_9 = arith.constant 0.000000e+00 : f32
    %17 = vector.broadcast %cst_9 : f32 to vector<40x8xf32>
    %18 = arith.maximumf %16, %17 : vector<40x8xf32>
    %19 = vector.broadcast %5 : vector<40x1xf32> to vector<40x8xf32>
    %20 = arith.mulf %19, %18 : vector<40x8xf32>
    %cst_10 = arith.constant dense<0.000000e+00> : vector<8xf32>
    %21 = vector.multi_reduction <add>, %20, %cst_10 [0] : vector<40x8xf32> to vector<8xf32>
    %22 = vector.shape_cast %21 : vector<8xf32> to vector<1x8xf32>
    %23 = vector.broadcast %6 : vector<1x1xf32> to vector<1x8xf32>
    %24 = arith.addf %22, %23 : vector<1x8xf32>
    %c0_11 = arith.constant 0 : index
    %c0_12 = arith.constant 0 : index
    %25 = vector.load %arg2[%c0_11, %c0_12] : memref<1x8xf32, #tpu.memory_space<vmem>>, vector<1x8xf32>
    tpu.vector_store %arg2[%c0_11, %c0_12], %24 {strides = array<i32>} : memref<1x8xf32, #tpu.memory_space<vmem>>, vector<1x8xf32>,
    return
  }
}

</mosaic_0001>

<bundles_post_ra>
// kernel: tpu_custom_call.1
= control target key start
LH: loop header
LB: loop body
LE: loop exit
PB: predicated region body
PF: predicated region fallthrough
CT: control target
= control target key end

     0   :  { %7 = vsyncpa [#allocation3], 0  ;;  %s577_s0 = inlined_call_operand.hbm [shape: f32[1,8], index: 0, kind: input, shape index: {}]   ;;  %s578_s1 = inlined_call_operand.hbm [shape: f32[40,45], index: 1, kind: input, shape index: {}]   ;;  %s579_s2 = inlined_call_operand.hbm [shape: f32[1,8], index: 2, kind: output, shape index: {}]  }
   0x1   :  { %8 = vsyncpa [#allocation6], 0 }
   0x2   :  { %9 = vsyncpa [#allocation4], 0  ;;  %s454_s9 = smov [#allocation2]   ;;  %s455_s11 = smov [#allocation5]  }
   0x3   :  { %s16_s10 = sshll.u32 %s454_s9, 4  ;;  %s25_s12 = sshll.u32 %s455_s11, 4  ;;  %s17_s10 = int_to_ptr.vmem [resolvable:$true] %s16_s10  ;;  %s482_s12 = int_to_ptr.vmem [resolvable:$true] %s25_s12 }
   0x4   :  { %s382_s15 = scalar_lea.hbm %s577_s0, 16 }
   0x5   :  { %p383_p0 = scmp.ne.s32.totalorder %s577_s0, %s382_s15  ;;  %p386_p1 = scmp.lt.u32.totalorder %s382_s15, %s577_s0 }
   0x7   :  { %p388_p2 = pnand %p386_p1, %p383_p0 }
   0x9   :  { %391 = shalt.err (!%p388_p2)
}
   0xa   :  { %s392_s20 = scalar_lea.vmem %s17_s10, 16  ;;  %s396_s21 = scalar_lea.vmem %s17_s10, 32 }
   0xb   :  { %p393_p3 = scmp.ne.s32.totalorder %s17_s10, %s392_s20  ;;  %p397_p4 = scmp.lt.s32.totalorder %s17_s10, %s17_s10 }
   0xc   :  { %p398_p5 = scmp.lt.s32.totalorder %s396_s21, %s392_s20 }
   0xe   :  { %p399_p6 = por %p398_p5, %p397_p4 }
  0x10   :  { %p400_p7 = pnand %p399_p6, %p393_p3 }
  0x12   :  { %403 = shalt.err (!%p400_p7)
}
  0x13   :  { %19 = dma.hbm_to_vmem [thread:$0]  %s577_s0, 16, %s17_s10, [#allocation3]  }
  0x14   :  { %s404_s26 = scalar_lea.hbm %s578_s1, 640 }
  0x15   :  { %p405_p8 = scmp.ne.s32.totalorder %s578_s1, %s404_s26  ;;  %p408_p9 = scmp.lt.u32.totalorder %s404_s26, %s578_s1 }
  0x17   :  { %p410_p10 = pnand %p408_p9, %p405_p8 }
  0x19   :  { %413 = shalt.err (!%p410_p10)
}
  0x1a   :  { %s414_s3 = scalar_lea.vmem %s482_s12, 640  ;;  %p419_p12 = scmp.lt.s32.totalorder %s482_s12, %s482_s12 }
  0x1b   :  { %p415_p11 = scmp.ne.s32.totalorder %s482_s12, %s414_s3  ;;  %p420_p13 = scmp.lt.s32.totalorder %s414_s3, %s414_s3 }
  0x1d   :  { %p421_p0 = por %p420_p13, %p419_p12 }
  0x1f   :  { %p422_p1 = pnand %p421_p0, %p415_p11 }
  0x21   :  { %425 = shalt.err (!%p422_p1)
}
  0x22   :  { %s456_s0 = smov 128   ;;  %s457_s4 = smov 8  }
  0x23   :  { %31 = dma.hbm_to_vmem [thread:$0]  %s578_s1, 640, %s482_s12, [#allocation6], %s456_s0, %s456_s0, %s457_s4  }
  0x24   :  { %448 = dma.done.wait [#allocation3], 16  }
  0x25   :  { %449 = vsyncadd [#allocation3], 4294967280 }
  0x26   :  { %450 = dma.done.wait [#allocation6], 640  }
  0x27   :  { %451 = vsyncadd [#allocation6], 4294966656  ;;  %v458_v0 = vmov 41   ;;  %v459_v1 = vmov 40   ;;  %v513_v2 = vld [vmem:[#allocation5] sm:$0xff]  ;;  %v517_v3 = vld [vmem:[#allocation5 + $0x8] sm:$0xff] }
  0x28   :  { %369 = vset.pattern.permute.xlu1 %v458_v0  ;;  %368 = vset.pattern.permute.xlu0 %v459_v1  ;;  %v521_v4 = vld [vmem:[#allocation5 + $0x10] sm:$0xff]  ;;  %v523_v5 = vld [vmem:[#allocation5 + $0x18] sm:$0xff]  ;;  %v460_v6 = vmov 0.0|0.0   ;;  %v529_v7 = vld [vmem:[#allocation5 + $0x20] sm:$0xff]  ;;  %vm461_vm0 = vmmov 0   ;;  %v462_v8 = vmov 0.0  }
  0x29   :  { %82 = vperm.xlu1 %369, %v513_v2   ;;  %47 = vperm.xlu0 %368, %v513_v2   ;;  %v463_v9 = vmov 42   ;;  %v464_v10 = vmov 43   ;;  %v465_v11 = vmov 44   ;;  %v44_v12 = vld [vmem:[#allocation5] sm:$0x1]  ;;  %vm131_vm1 = vcmask 326656  }
  0x2a   :  { %343 = vmatprep.subr.bf16.mxu0 %v460_v6  ;;  %349 = vmatprep.subr.bf16.mxu1 %v460_v6  ;;  %v302_v13 = vld [vmem:[#allocation2] ss:$0 sm:$0xff]  ;;  %vm262_vm2 = vcmask 64512   ;;  %s466_s1 = smov [#allocation7]   ;;  %vm284_vm3 = vcmask 57344  }
  0x2b   :  { %328 = vmatprep.mubr.msk.f32.mxu0 %vm461_vm0, %v462_v8  ;;  %337 = vmatprep.mubr.msk.f32.mxu1 %vm461_vm0, %v462_v8  ;;  %s292_s7 = sshll.u32 %s466_s1, 4  ;;  %s293_s7 = int_to_ptr.vmem [resolvable:$true] %s292_s7 }
  0x2c   :  { %s426_s8 = scalar_lea.vmem %s293_s7, 16  ;;  %s430_s9 = scalar_lea.vmem %s293_s7, 32 }
  0x2d   :  { %86 = vperm.xlu1 %369, %v517_v3   ;;  %52 = vperm.xlu0 %368, %v517_v3   ;;  %p427_p2 = scmp.ne.s32.totalorder %s293_s7, %s426_s8  ;;  %p431_p3 = scmp.lt.s32.totalorder %s293_s7, %s293_s7 }
  0x2e   :  { %p432_p4 = scmp.lt.s32.totalorder %s430_s9, %s426_s8 }
  0x30   :  { %p433_p5 = por %p432_p4, %p431_p3 }
  0x31   :  { %370 = vset.pattern.permute.xlu1 %v459_v1  ;;  %57 = vperm.xlu0 %368, %v521_v4  }
  0x32   :  { %62 = vperm.xlu1 %370, %v523_v5   ;;  %p434_p6 = pnand %p433_p5, %p427_p2 }
  0x35   :  { %371 = vset.pattern.permute.xlu0 %v458_v0 }
  0x36   :  { %372 = vset.pattern.permute.xlu1 %v458_v0  ;;  %90 = vperm.xlu0 %371, %v521_v4  }
  0x37   :  { %94 = vperm.xlu1 %372, %v523_v5  }
  0x3a   :  { %98 = vperm.xlu0 %371, %v529_v7  }
  0x3b   :  { %373 = vset.pattern.permute.xlu1 %v459_v1 }
  0x3c   :  { %67 = vperm.xlu1 %373, %v529_v7  }
  0x3e   :  { %375 = vset.pattern.permute.xlu0 %v463_v9 }
  0x3f   :  { %116 = vperm.xlu0 %375, %v517_v3  }
  0x40   :  { %374 = vset.pattern.permute.xlu1 %v463_v9 }
  0x41   :  { %112 = vperm.xlu1 %374, %v513_v2  }
  0x43   :  { %376 = vset.pattern.permute.xlu0 %v464_v10 }
  0x44   :  { %238 = vperm.xlu0 %376, %v513_v2  }
  0x45   :  { %120 = vperm.xlu1 %374, %v521_v4  }
  0x48   :  { %246 = vperm.xlu0 %376, %v521_v4  }
  0x49   :  { %124 = vperm.xlu1 %374, %v523_v5  }
  0x4c   :  { %254 = vperm.xlu0 %376, %v529_v7  }
  0x4d   :  { %377 = vset.pattern.permute.xlu1 %v464_v10 }
  0x4e   :  { %242 = vperm.xlu1 %377, %v517_v3  }
  0x50   :  { %381 = vset.pattern.permute.xlu0 %v465_v11 }
  0x52   :  { %378 = vset.pattern.permute.xlu1 %v463_v9 }
  0x53   :  { %128 = vperm.xlu1 %378, %v529_v7  }
  0x57   :  { %379 = vset.pattern.permute.xlu1 %v464_v10 }
  0x58   :  { %250 = vperm.xlu1 %379, %v523_v5  }
  0x5c   :  { %380 = vset.pattern.permute.xlu1 %v465_v11 }
  0x5d   :  { %280 = vperm.xlu1 %380, %v44_v12  }
  0xa8   :  { %v83_v14 = vpop.permute.xlu1 %82  ;;  %v48_v15 = vpop.permute.xlu0 %47 }
  0xa9   :  { %v76_v16 = vmul.f32 %v302_v13, %v48_v15 }
  0xab   :  { %v101_v19 = vadd.f32 %v83_v14, %v76_v16 }
  0xac   :  { %v87_v17 = vpop.permute.xlu1 %86  ;;  %v53_v18 = vpop.permute.xlu0 %52 }
  0xad   :  { %v77_v20 = vmul.f32 %v302_v13, %v53_v18  ;;  %v106_v23 = vmax.f32 %v101_v19, 0.0 }
  0xaf   :  { %v102_v21 = vadd.f32 %v87_v17, %v77_v20 }
  0xb0   :  { %v58_v22 = vpop.permute.xlu0 %57 }
  0xb1   :  { %v107_v24 = vmax.f32 %v102_v21, 0.0  ;;  %v63_v25 = vpop.permute.xlu1 %62  ;;  %v78_v27 = vmul.f32 %v302_v13, %v58_v22 }
  0xb2   :  { %v79_v28 = vmul.f32 %v302_v13, %v63_v25 }
  0xb3   :  { %v344_v26 = vpack.c.bf16 %v107_v24, %v106_v23 }
  0xb5   :  { %v91_v29 = vpop.permute.xlu0 %90  ;;  %345 = vmatpush3.bf16.msra.mxu0 %v344_v26  ;;  %352 = vmatpush3.bf16.msra.mxu1 %v344_v26 }
  0xb6   :  { %v103_v30 = vadd.f32 %v91_v29, %v78_v27  ;;  %v95_v31 = vpop.permute.xlu1 %94  ;;  %346 = vmatprep.subr.bf16.mxu0 %v460_v6  ;;  %350 = vmatprep.subr.bf16.mxu1 %v460_v6 }
  0xb7   :  { %v104_v32 = vadd.f32 %v95_v31, %v79_v28 }
  0xb8   :  { %v108_v33 = vmax.f32 %v103_v30, 0.0 }
  0xb9   :  { %v109_v34 = vmax.f32 %v104_v32, 0.0  ;;  %v99_v38 = vpop.permute.xlu0 %98 }
  0xbb   :  { %v347_v35 = vpack.c.bf16 %v109_v34, %v108_v33  ;;  %v68_v36 = vpop.permute.xlu1 %67 }
  0xbc   :  { %v80_v37 = vmul.f32 %v302_v13, %v68_v36 }
  0xbd   :  { %348 = vmatpush3.bf16.msra.mxu0 %v347_v35  ;;  %353 = vmatpush3.bf16.msra.mxu1 %v347_v35 }
  0xbe   :  { %v105_v39 = vadd.f32 %v99_v38, %v80_v37  ;;  %326 = vmatprep.subr.mxu0 %v462_v8  ;;  %351 = vmatprep.subr.mxu1 %v462_v8  ;;  %v117_v44 = vpop.permute.xlu0 %116 }
  0xc0   :  { %v110_v40 = vmax.f32 %v105_v39, 0.0  ;;  %v113_v41 = vpop.permute.xlu1 %112 }
  0xc2   :  { %327 = vmatpush3.msra.mxu0 %v110_v40  ;;  %354 = vmatpush3.msra.mxu1 %v110_v40 }
  0xc3   :  { %329 = vmatmul.mubr.msk.f32.vlgmr.msra.gmra.mrb[0].mxu0 %vm131_vm1, %v513_v2  ;;  %338 = vmatmul.mubr.msk.f32.vlgmr.msra.gmra.mrb[0].mxu1 %vm131_vm1, %v523_v5  ;;  %v239_v46 = vpop.permute.xlu0 %238 }
  0xc4   :  { %331 = vmatprep.mubr.msk.f32.mxu0 %vm461_vm0, %v462_v8  ;;  %340 = vmatprep.mubr.msk.f32.mxu1 %vm461_vm0, %v462_v8  ;;  %v121_v42 = vpop.permute.xlu1 %120 }
  0xc7   :  { %332 = vmatmul.mubr.msk.f32.gmra.mrb[2].mxu0 %vm131_vm1, %v517_v3  ;;  %341 = vmatmul.mubr.msk.f32.gmra.mrb[2].mxu1 %vm131_vm1, %v529_v7  ;;  %v247_v60 = vpop.permute.xlu0 %246 }
  0xc8   :  { %334 = vmatprep.mubr.msk.f32.mxu0 %vm461_vm0, %v462_v8  ;;  %v125_v43 = vpop.permute.xlu1 %124 }
  0xcb   :  { %335 = vmatmul.mubr.msk.f32.gmra.mrb[4].mxu0 %vm131_vm1, %v521_v4  ;;  %v255_v11 = vpop.permute.xlu0 %254 }
  0xcd   :  { %v243_v45 = vpop.permute.xlu1 %242 }
  0xd2   :  { %v129_v52 = vpop.permute.xlu1 %128 }
  0xd7   :  { %v251_v5 = vpop.permute.xlu1 %250 }
  0xdc   :  { %v281_v26 = vpop.permute.xlu1 %280 }
 0x196   :  { %v208_v47 = vpop.f32.mrb[0].mxu0  ;;  %v223_v48 = vpop.f32.mrb[0].mxu1 }
 0x197   :  { %v209_v49 = vadd.f32 %v208_v47, %v113_v41  ;;  %v330_v50 = vpop.f32.mrb[1].mxu0  ;;  %v339_v51 = vpop.f32.mrb[1].mxu1  ;;  %v224_v56 = vadd.f32 %v223_v48, %v125_v43 }
 0x199   :  { %v232_v53 = vmax.f32 %v209_v49, 0.0  ;;  %v235_v1 = vmax.f32 %v224_v56, 0.0 }
 0x19a   :  { %v213_v54 = vpop.f32.mrb[2].mxu0  ;;  %v228_v55 = vpop.f32.mrb[2].mxu1 }
 0x19b   :  { %v214_v57 = vadd.f32 %v213_v54, %v117_v44  ;;  %v333_v58 = vpop.f32.mrb[3].mxu0  ;;  %v342_v59 = vpop.f32.mrb[3].mxu1  ;;  %v257_v61 = vmul.f32 %v239_v46, %v232_v53  ;;  %v229_v63 = vadd.f32 %v228_v55, %v129_v52  ;;  %v260_v12 = vmul.f32 %v251_v5, %v235_v1 }
 0x19d   :  { %v233_v62 = vmax.f32 %v214_v57, 0.0  ;;  %v263_v6 = vsel %vm262_vm2, %v257_v61, 0.0  ;;  %v236_v8 = vmax.f32 %v229_v63, 0.0  ;;  %v268_v17 = vsel %vm262_vm2, %v260_v12, 0.0 }
 0x19e   :  { %v218_v0 = vpop.f32.mrb[4].mxu0 }
 0x19f   :  { %v258_v2 = vmul.f32 %v243_v45, %v233_v62  ;;  %v219_v3 = vadd.f32 %v218_v0, %v121_v42  ;;  %v336_v4 = vpop.f32.mrb[5].mxu0  ;;  %v261_v14 = vmul.f32 %v255_v11, %v236_v8 }
 0x1a1   :  { %v264_v7 = vsel %vm262_vm2, %v258_v2, 0.0  ;;  %v234_v9 = vmax.f32 %v219_v3, 0.0  ;;  %v270_v19 = vsel %vm262_vm2, %v261_v14, 0.0 }
 0x1a2   :  { %v265_v10 = vadd.f32 %v264_v7, %v263_v6 }
 0x1a3   :  { %v259_v13 = vmul.f32 %v247_v60, %v234_v9 }
 0x1a5   :  { %v266_v15 = vsel %vm262_vm2, %v259_v13, 0.0 }
 0x1a6   :  { %v267_v16 = vadd.f32 %v266_v15, %v265_v10 }
 0x1a8   :  { %v269_v18 = vadd.f32 %v268_v17, %v267_v16 }
 0x1aa   :  { %v271_v20 = vadd.f32 %v270_v19, %v269_v18 }
 0x1ac   :  { %v272_v21 = vrot.slane %v271_v20, 4 }
 0x1ae   :  { %v273_v22 = vadd.f32 %v272_v21, %v271_v20 }
 0x1b0   :  { %v274_v23 = vrot.slane %v273_v22, 2 }
 0x1b2   :  { %v275_v24 = vadd.f32 %v274_v23, %v273_v22 }
 0x1b4   :  { %v276_v25 = vrot.slane %v275_v24, 1 }
 0x1b6   :  { %v277_v27 = vadd.f32 %v276_v25, %v275_v24 }
 0x1b8   :  { %v283_v28 = vadd.f32 %v281_v26, %v277_v27 }
 0x1ba   :  { %285 = vst.msk [vmem:[#allocation7] sm:$0x1] %vm284_vm3, %v283_v28 }
 0x1bb   :  { %437 = shalt.err (!%p434_p6)
}
 0x1bc   :  { %s438_s12 = scalar_lea.hbm %s579_s2, 16 }
 0x1bd   :  { %p439_p7 = scmp.ne.s32.totalorder %s579_s2, %s438_s12  ;;  %p442_p8 = scmp.lt.u32.totalorder %s438_s12, %s579_s2 }
 0x1bf   :  { %p444_p9 = pnand %p442_p8, %p439_p7 }
 0x1c1   :  { %447 = shalt.err (!%p444_p9)
}
 0x1c2   :  { %295 = dma.vmem_to_hbm [thread:$0]  %s293_s7, 16, %s579_s2, [#allocation4]  }
 0x1c3   :  { %452 = dma.done.wait [#allocation4], 16  }
 0x1c4   :  { %453 = vsyncadd [#allocation4], 4294967280 }
 0x1c5   :  { %299 = vsyncpa [#allocation3], 1 }
 0x1c6   :  { %300 = vsyncpa [#allocation6], 1 }
 0x1c7   :  { %301 = vsyncpa [#allocation4], 1 }

</bundles_post_ra>
